<compile_context>
chip_gen: v5e
topology: v5e:2x2
jax: 0.10.0
libtpu: 0.0.40
codegen_flags: <defaults>
</compile_context>

<pallas_src>
import jax
import jax.numpy as jnp
import numpy as np
from jax.experimental import pallas as pl
from jax.experimental.pallas import tpu as pltpu

# ---------------- synthetic config (small) ----------------
HIDDEN    = 32           # config.hidden_size
IMG       = 16           # img_size
PATCH     = 4            # config.patches['size']
IN_CH     = 3            # in_channels
SD_LEN    = 8            # config.sd_len
SD_DIM    = 768          # fixed in module: Linear(768, hidden)
TEE_LEN   = 4            # config.tee_len
N_SCALAR  = 14           # sex, age, ..., UseEarpiece
GRID_HW   = IMG // PATCH
N_PATCHES = GRID_HW * GRID_HW
SEQ       = 1 + N_PATCHES
PATCH_DIM = IN_CH * PATCH * PATCH
MISC      = TEE_LEN + N_SCALAR          # tee rows + 14 scalar rows


# ---------------- fused Pallas kernel ----------------
def _fused_kernel(patches_ref, w_patch_ref, posb_ref,
                  sd_ref, w_sd_ref, sdb_ref,
                  misc_ref, w_misc_ref, bpe_misc_ref,
                  emb_ref, sd_out_ref, tee_out_ref, *sc_out_refs):
    # Patch path (MXU), batch folded into M.  The cls slot is a zero input row,
    # and its bias row already holds cls_token + position_embeddings[0]; the
    # other bias rows hold pos[1:] + conv bias.  -> one full-block store.
    emb_ref[...] = (jnp.dot(patches_ref[...], w_patch_ref[...],
                            preferred_element_type=jnp.float32)
                    + posb_ref[...])

    # sd path (MXU), batch folded into M; bias + pe_sd packed per row.
    sd_out_ref[...] = (jnp.dot(sd_ref[...], w_sd_ref[...],
                               preferred_element_type=jnp.float32)
                       + sdb_ref[...])

    # tee + 14 scalar Linear(1, H) layers fused: one VPU broadcast-mul-add.
    m = (misc_ref[...] * w_misc_ref[...][None, :, :]
         + bpe_misc_ref[...][None, :, :])                       # (B, MISC, H)
    tee_out_ref[...] = m[:, :TEE_LEN, :]
    for f in range(N_SCALAR):                                    # static slices
        sc_out_refs[f][...] = m[:, TEE_LEN + f:TEE_LEN + f + 1, :]


def _full_spec(shape):
    nd = len(shape)
    return pl.BlockSpec(shape, lambda i, _nd=nd: (0,) * _nd)


def _fused_call(patches_aug, w_patch, posb, sd_flat, w_sd, sdb,
                x_misc, w_misc, bpe_misc):
    B = x_misc.shape[0]
    H = w_patch.shape[1]
    ins = [patches_aug, w_patch, posb, sd_flat, w_sd, sdb,
           x_misc, w_misc, bpe_misc]
    out_shape = ((jax.ShapeDtypeStruct((B * SEQ, H), jnp.float32),
                  jax.ShapeDtypeStruct((B * SD_LEN, H), jnp.float32),
                  jax.ShapeDtypeStruct((B, TEE_LEN, H), jnp.float32))
                 + tuple(jax.ShapeDtypeStruct((B, 1, H), jnp.float32)
                         for _ in range(N_SCALAR)))
    return pl.pallas_call(
        _fused_kernel,
        out_shape=out_shape,
        grid=(1,),                      # single step; everything fits in VMEM
        in_specs=[_full_spec(a.shape) for a in ins],
        out_specs=tuple(_full_spec(s.shape) for s in out_shape),
        compiler_params=pltpu.CompilerParams(
            dimension_semantics=("arbitrary",)),
    )(*ins)


# ---------------- glue: patch extraction (layout only, no compute) ----------
def extract_patches(x):
    """NCHW -> (B, n_patches, C*P*P), matching Conv2d(kernel=stride=P) +
    flatten(2).transpose(-1,-2) token ordering."""
    B, C, Hh, Ww = x.shape
    hp, wp = Hh // PATCH, Ww // PATCH
    x = x.reshape(B, C, hp, PATCH, wp, PATCH)
    x = x.transpose(0, 2, 4, 1, 3, 5)            # (B, hp, wp, C, P, P)
    return x.reshape(B, hp * wp, C * PATCH * PATCH)


def pack_params(p):
    """Batch-independent packing of biases / per-row weights (done once)."""
    # Row 0: cls + pos[0]   (patch input row is zero there);
    # Rows 1..NP: pos[1:] + conv bias.
    posb = jnp.concatenate(
        [p["cls"][0] + p["pos"][:, 0, :],              # (1, H)
         p["pos"][0, 1:, :] + p["b_patch"]], axis=0)   # (NP, H)
    sdb = p["b_sd"] + p["pe_sd"][0]                    # (SD_LEN, H)
    w_misc = jnp.concatenate(
        [jnp.broadcast_to(p["w_tee"], (TEE_LEN, HIDDEN)), p["w_sc"]], axis=0)
    bpe_misc = jnp.concatenate(
        [p["b_tee"] + p["pe_tee"][0], p["b_sc"] + p["pe_sc"]], axis=0)
    return {"w_patch": p["w_patch"], "posb": posb,
            "w_sd": p["w_sd"], "sdb": sdb,
            "w_misc": w_misc, "bpe_misc": bpe_misc}


def embeddings_forward(packed, x, sd, tee, scalars):
    """scalars: list of 14 arrays, each (B, 1, 1). Returns the 17-tuple."""
    B = x.shape[0]
    patches = extract_patches(x)                                 # (B, NP, PD)
    patches_aug = jnp.pad(patches, ((0, 0), (1, 0), (0, 0)))     # zero cls row
    patches_aug = patches_aug.reshape(B * SEQ, PATCH_DIM)        # (B*SEQ, PD)
    sd_flat = sd.reshape(B * SD_LEN, SD_DIM)                     # (B*SD_LEN, 768)
    x_misc = jnp.concatenate([tee] + list(scalars), axis=1)      # (B, MISC, 1)
    posb = jnp.tile(packed["posb"], (B, 1))                      # (B*SEQ, H)
    sdb = jnp.tile(packed["sdb"], (B, 1))                        # (B*SD_LEN, H)

    outs = _fused_call(patches_aug, packed["w_patch"], posb,
                       sd_flat, packed["w_sd"], sdb,
                       x_misc, packed["w_misc"], packed["bpe_misc"])
    emb2d, sd2d, tee_emb, *scalar_embs = outs
    emb = emb2d.reshape(B, SEQ, HIDDEN)        # contiguous reshape (free)
    sd_emb = sd2d.reshape(B, SD_LEN, HIDDEN)   # contiguous reshape (free)
    return (emb, sd_emb, tee_emb, *scalar_embs)


# ---------------- reference (plain JAX, unpacked params) ----------------
def embeddings_reference(params, x, sd, tee, scalars):
    patches = extract_patches(x)
    pe = patches @ params["w_patch"] + params["b_patch"]          # (B, NP, H)
    B = x.shape[0]
    cls = jnp.broadcast_to(params["cls"], (B, 1, HIDDEN))
    emb = jnp.concatenate([cls, pe], axis=1) + params["pos"]
    sd_emb = sd @ params["w_sd"] + params["b_sd"] + params["pe_sd"]
    tee_emb = tee * params["w_tee"] + params["b_tee"] + params["pe_tee"]
    outs = [emb, sd_emb, tee_emb]
    for f in range(N_SCALAR):
        outs.append(scalars[f] * params["w_sc"][f] + params["b_sc"][f]
                    + params["pe_sc"][f])
    return tuple(outs)


# ---------------- deterministic param init ----------------
def init_params(key):
    ks = jax.random.split(key, 16)
    p = {}
    p["w_patch"] = 0.02 * jax.random.normal(ks[0], (PATCH_DIM, HIDDEN), jnp.float32)
    p["b_patch"] = 0.02 * jax.random.normal(ks[1], (1, HIDDEN), jnp.float32)
    p["w_sd"]    = 0.02 * jax.random.normal(ks[2], (SD_DIM, HIDDEN), jnp.float32)
    p["b_sd"]    = 0.02 * jax.random.normal(ks[3], (1, HIDDEN), jnp.float32)
    p["w_tee"]   = 0.02 * jax.random.normal(ks[4], (1, HIDDEN), jnp.float32)
    p["b_tee"]   = 0.02 * jax.random.normal(ks[5], (1, HIDDEN), jnp.float32)
    p["w_sc"]    = 0.02 * jax.random.normal(ks[6], (N_SCALAR, HIDDEN), jnp.float32)
    p["b_sc"]    = 0.02 * jax.random.normal(ks[7], (N_SCALAR, HIDDEN), jnp.float32)
    # positional params are zeros in the PyTorch __init__, but we use small
    # random values here so the adds are actually exercised.
    p["pos"]    = 0.01 * jax.random.normal(ks[8],  (1, SEQ, HIDDEN), jnp.float32)
    p["pe_sd"]  = 0.01 * jax.random.normal(ks[9],  (1, SD_LEN, HIDDEN), jnp.float32)
    p["pe_tee"] = 0.01 * jax.random.normal(ks[10], (1, TEE_LEN, HIDDEN), jnp.float32)
    p["pe_sc"]  = 0.01 * jax.random.normal(ks[11], (N_SCALAR, HIDDEN), jnp.float32)
    p["cls"]    = 0.01 * jax.random.normal(ks[12], (1, 1, HIDDEN), jnp.float32)
    return p


if __name__ == "__main__":
    B = 2
    key = jax.random.PRNGKey(0)
    kp, kx, ksd, kt, ksc = jax.random.split(key, 5)
    params = init_params(kp)
    packed = pack_params(params)

    x = jax.random.normal(kx, (B, IN_CH, IMG, IMG), jnp.float32)   # NCHW
    sd = jax.random.normal(ksd, (B, SD_LEN, SD_DIM), jnp.float32)
    tee = jax.random.normal(kt, (B, TEE_LEN, 1), jnp.float32)
    sck = jax.random.split(ksc, N_SCALAR)
    scalars = [jax.random.normal(sck[f], (B, 1, 1), jnp.float32)
               for f in range(N_SCALAR)]

    fwd = jax.jit(embeddings_forward)
    outs = jax.block_until_ready(fwd(packed, x, sd, tee, scalars))

    refs = embeddings_reference(params, x, sd, tee, scalars)
    for o, r in zip(outs, refs):
        np.testing.assert_allclose(np.asarray(o), np.asarray(r),
                                   rtol=1e-5, atol=1e-5)

    print("KERNEL_OK")
</pallas_src>

<mosaic_0001>
module attributes {stable_mosaic.version = 11 : i64} {
  func.func @_fused_kernel(%arg0: i32, %arg1: memref<34x48xf32, #tpu.memory_space<vmem>>, %arg2: memref<48x32xf32, #tpu.memory_space<vmem>>, %arg3: memref<34x32xf32, #tpu.memory_space<vmem>>, %arg4: memref<16x768xf32, #tpu.memory_space<vmem>>, %arg5: memref<768x32xf32, #tpu.memory_space<vmem>>, %arg6: memref<16x32xf32, #tpu.memory_space<vmem>>, %arg7: memref<2x18x1xf32, #tpu.memory_space<vmem>>, %arg8: memref<18x32xf32, #tpu.memory_space<vmem>>, %arg9: memref<18x32xf32, #tpu.memory_space<vmem>>, %arg10: memref<34x32xf32, #tpu.memory_space<vmem>>, %arg11: memref<16x32xf32, #tpu.memory_space<vmem>>, %arg12: memref<2x4x32xf32, #tpu.memory_space<vmem>>, %arg13: memref<2x1x32xf32, #tpu.memory_space<vmem>>, %arg14: memref<2x1x32xf32, #tpu.memory_space<vmem>>, %arg15: memref<2x1x32xf32, #tpu.memory_space<vmem>>, %arg16: memref<2x1x32xf32, #tpu.memory_space<vmem>>, %arg17: memref<2x1x32xf32, #tpu.memory_space<vmem>>, %arg18: memref<2x1x32xf32, #tpu.memory_space<vmem>>, %arg19: memref<2x1x32xf32, #tpu.memory_space<vmem>>, %arg20: memref<2x1x32xf32, #tpu.memory_space<vmem>>, %arg21: memref<2x1x32xf32, #tpu.memory_space<vmem>>, %arg22: memref<2x1x32xf32, #tpu.memory_space<vmem>>, %arg23: memref<2x1x32xf32, #tpu.memory_space<vmem>>, %arg24: memref<2x1x32xf32, #tpu.memory_space<vmem>>, %arg25: memref<2x1x32xf32, #tpu.memory_space<vmem>>, %arg26: memref<2x1x32xf32, #tpu.memory_space<vmem>>) attributes {dimension_semantics = [#tpu.dimension_semantics<arbitrary>], iteration_bounds = array<i64: 1>, scalar_prefetch = 0 : i64, scratch_operands = 0 : i64, tpu.core_type = #tpu.core_type<tc>, window_params = [{pipeline_mode = #tpu.pipeline_mode<synchronous>, transform_indices = @transform_0, window_bounds = array<i64: 34, 48>}, {pipeline_mode = #tpu.pipeline_mode<synchronous>, transform_indices = @transform_1, window_bounds = array<i64: 48, 32>}, {pipeline_mode = #tpu.pipeline_mode<synchronous>, transform_indices = @transform_2, window_bounds = array<i64: 34, 32>}, {pipeline_mode = #tpu.pipeline_mode<synchronous>, transform_indices = @transform_3, window_bounds = array<i64: 16, 768>}, {pipeline_mode = #tpu.pipeline_mode<synchronous>, transform_indices = @transform_4, window_bounds = array<i64: 768, 32>}, {pipeline_mode = #tpu.pipeline_mode<synchronous>, transform_indices = @transform_5, window_bounds = array<i64: 16, 32>}, {pipeline_mode = #tpu.pipeline_mode<synchronous>, transform_indices = @transform_6, window_bounds = array<i64: 2, 18, 1>}, {pipeline_mode = #tpu.pipeline_mode<synchronous>, transform_indices = @transform_7, window_bounds = array<i64: 18, 32>}, {pipeline_mode = #tpu.pipeline_mode<synchronous>, transform_indices = @transform_8, window_bounds = array<i64: 18, 32>}, {pipeline_mode = #tpu.pipeline_mode<synchronous>, transform_indices = @transform_9, window_bounds = array<i64: 34, 32>}, {pipeline_mode = #tpu.pipeline_mode<synchronous>, transform_indices = @transform_10, window_bounds = array<i64: 16, 32>}, {pipeline_mode = #tpu.pipeline_mode<synchronous>, transform_indices = @transform_11, window_bounds = array<i64: 2, 4, 32>}, {pipeline_mode = #tpu.pipeline_mode<synchronous>, transform_indices = @transform_12, window_bounds = array<i64: 2, 1, 32>}, {pipeline_mode = #tpu.pipeline_mode<synchronous>, transform_indices = @transform_13, window_bounds = array<i64: 2, 1, 32>}, {pipeline_mode = #tpu.pipeline_mode<synchronous>, transform_indices = @transform_14, window_bounds = array<i64: 2, 1, 32>}, {pipeline_mode = #tpu.pipeline_mode<synchronous>, transform_indices = @transform_15, window_bounds = array<i64: 2, 1, 32>}, {pipeline_mode = #tpu.pipeline_mode<synchronous>, transform_indices = @transform_16, window_bounds = array<i64: 2, 1, 32>}, {pipeline_mode = #tpu.pipeline_mode<synchronous>, transform_indices = @transform_17, window_bounds = array<i64: 2, 1, 32>}, {pipeline_mode = #tpu.pipeline_mode<synchronous>, transform_indices = @transform_18, window_bounds = array<i64: 2, 1, 32>}, {pipeline_mode = #tpu.pipeline_mode<synchronous>, transform_indices = @transform_19, window_bounds = array<i64: 2, 1, 32>}, {pipeline_mode = #tpu.pipeline_mode<synchronous>, transform_indices = @transform_20, window_bounds = array<i64: 2, 1, 32>}, {pipeline_mode = #tpu.pipeline_mode<synchronous>, transform_indices = @transform_21, window_bounds = array<i64: 2, 1, 32>}, {pipeline_mode = #tpu.pipeline_mode<synchronous>, transform_indices = @transform_22, window_bounds = array<i64: 2, 1, 32>}, {pipeline_mode = #tpu.pipeline_mode<synchronous>, transform_indices = @transform_23, window_bounds = array<i64: 2, 1, 32>}, {pipeline_mode = #tpu.pipeline_mode<synchronous>, transform_indices = @transform_24, window_bounds = array<i64: 2, 1, 32>}, {pipeline_mode = #tpu.pipeline_mode<synchronous>, transform_indices = @transform_25, window_bounds = array<i64: 2, 1, 32>}]} {
    %c0 = arith.constant 0 : index
    %c0_0 = arith.constant 0 : index
    %0 = vector.load %arg1[%c0, %c0_0] : memref<34x48xf32, #tpu.memory_space<vmem>>, vector<34x48xf32>
    %c0_1 = arith.constant 0 : index
    %c0_2 = arith.constant 0 : index
    %1 = vector.load %arg2[%c0_1, %c0_2] : memref<48x32xf32, #tpu.memory_space<vmem>>, vector<48x32xf32>
    %cst = arith.constant dense<0.000000e+00> : vector<34x32xf32>
    %2 = tpu.matmul %0, %1, %cst {dimension_numbers = #tpu.dot_dimension_numbers<[1], [0], [0], [1], [0, 0, 1, 1], [], []>} : vector<34x48xf32>, vector<48x32xf32>, vector<34x32xf32> -> vector<34x32xf32>
    %c0_3 = arith.constant 0 : index
    %c0_4 = arith.constant 0 : index
    %3 = vector.load %arg3[%c0_3, %c0_4] : memref<34x32xf32, #tpu.memory_space<vmem>>, vector<34x32xf32>
    %4 = arith.addf %2, %3 : vector<34x32xf32>
    %c0_5 = arith.constant 0 : index
    %c0_6 = arith.constant 0 : index
    %5 = vector.load %arg10[%c0_5, %c0_6] : memref<34x32xf32, #tpu.memory_space<vmem>>, vector<34x32xf32>
    tpu.vector_store %arg10[%c0_5, %c0_6], %4 {strides = array<i32>} : memref<34x32xf32, #tpu.memory_space<vmem>>, vector<34x32xf32>,
    %c0_7 = arith.constant 0 : index
    %c0_8 = arith.constant 0 : index
    %6 = vector.load %arg4[%c0_7, %c0_8] : memref<16x768xf32, #tpu.memory_space<vmem>>, vector<16x768xf32>
    %c0_9 = arith.constant 0 : index
    %c0_10 = arith.constant 0 : index
    %7 = vector.load %arg5[%c0_9, %c0_10] : memref<768x32xf32, #tpu.memory_space<vmem>>, vector<768x32xf32>
    %cst_11 = arith.constant dense<0.000000e+00> : vector<16x32xf32>
    %8 = tpu.matmul %6, %7, %cst_11 {dimension_numbers = #tpu.dot_dimension_numbers<[1], [0], [0], [1], [0, 0, 1, 1], [], []>} : vector<16x768xf32>, vector<768x32xf32>, vector<16x32xf32> -> vector<16x32xf32>
    %c0_12 = arith.constant 0 : index
    %c0_13 = arith.constant 0 : index
    %9 = vector.load %arg6[%c0_12, %c0_13] : memref<16x32xf32, #tpu.memory_space<vmem>>, vector<16x32xf32>
    %10 = arith.addf %8, %9 : vector<16x32xf32>
    %c0_14 = arith.constant 0 : index
    %c0_15 = arith.constant 0 : index
    %11 = vector.load %arg11[%c0_14, %c0_15] : memref<16x32xf32, #tpu.memory_space<vmem>>, vector<16x32xf32>
    tpu.vector_store %arg11[%c0_14, %c0_15], %10 {strides = array<i32>} : memref<16x32xf32, #tpu.memory_space<vmem>>, vector<16x32xf32>,
    %c0_16 = arith.constant 0 : index
    %c0_17 = arith.constant 0 : index
    %c0_18 = arith.constant 0 : index
    %12 = vector.load %arg7[%c0_16, %c0_17, %c0_18] : memref<2x18x1xf32, #tpu.memory_space<vmem>>, vector<2x18x1xf32>
    %c0_19 = arith.constant 0 : index
    %c0_20 = arith.constant 0 : index
    %13 = vector.load %arg8[%c0_19, %c0_20] : memref<18x32xf32, #tpu.memory_space<vmem>>, vector<18x32xf32>
    %14 = vector.shape_cast %13 : vector<18x32xf32> to vector<1x18x32xf32>
    %15 = vector.broadcast %12 : vector<2x18x1xf32> to vector<2x18x32xf32>
    %16 = vector.broadcast %14 : vector<1x18x32xf32> to vector<2x18x32xf32>
    %17 = arith.mulf %15, %16 : vector<2x18x32xf32>
    %c0_21 = arith.constant 0 : index
    %c0_22 = arith.constant 0 : index
    %18 = vector.load %arg9[%c0_21, %c0_22] : memref<18x32xf32, #tpu.memory_space<vmem>>, vector<18x32xf32>
    %19 = vector.shape_cast %18 : vector<18x32xf32> to vector<1x18x32xf32>
    %20 = vector.broadcast %19 : vector<1x18x32xf32> to vector<2x18x32xf32>
    %21 = arith.addf %17, %20 : vector<2x18x32xf32>
    %22 = vector.extract_strided_slice %21 {offsets = [0, 0, 0], sizes = [2, 4, 32], strides = [1, 1, 1]} : vector<2x18x32xf32> to vector<2x4x32xf32>
    %c0_23 = arith.constant 0 : index
    %c0_24 = arith.constant 0 : index
    %c0_25 = arith.constant 0 : index
    %23 = vector.load %arg12[%c0_23, %c0_24, %c0_25] : memref<2x4x32xf32, #tpu.memory_space<vmem>>, vector<2x4x32xf32>
    tpu.vector_store %arg12[%c0_23, %c0_24, %c0_25], %22 {strides = array<i32>} : memref<2x4x32xf32, #tpu.memory_space<vmem>>, vector<2x4x32xf32>,
    %24 = vector.extract_strided_slice %21 {offsets = [0, 4, 0], sizes = [2, 1, 32], strides = [1, 1, 1]} : vector<2x18x32xf32> to vector<2x1x32xf32>
    %c0_26 = arith.constant 0 : index
    %c0_27 = arith.constant 0 : index
    %c0_28 = arith.constant 0 : index
    %25 = vector.load %arg13[%c0_26, %c0_27, %c0_28] : memref<2x1x32xf32, #tpu.memory_space<vmem>>, vector<2x1x32xf32>
    tpu.vector_store %arg13[%c0_26, %c0_27, %c0_28], %24 {strides = array<i32>} : memref<2x1x32xf32, #tpu.memory_space<vmem>>, vector<2x1x32xf32>,
    %26 = vector.extract_strided_slice %21 {offsets = [0, 5, 0], sizes = [2, 1, 32], strides = [1, 1, 1]} : vector<2x18x32xf32> to vector<2x1x32xf32>
    %c0_29 = arith.constant 0 : index
    %c0_30 = arith.constant 0 : index
    %c0_31 = arith.constant 0 : index
    %27 = vector.load %arg14[%c0_29, %c0_30, %c0_31] : memref<2x1x32xf32, #tpu.memory_space<vmem>>, vector<2x1x32xf32>
    tpu.vector_store %arg14[%c0_29, %c0_30, %c0_31], %26 {strides = array<i32>} : memref<2x1x32xf32, #tpu.memory_space<vmem>>, vector<2x1x32xf32>,
    %28 = vector.extract_strided_slice %21 {offsets = [0, 6, 0], sizes = [2, 1, 32], strides = [1, 1, 1]} : vector<2x18x32xf32> to vector<2x1x32xf32>
    %c0_32 = arith.constant 0 : index
    %c0_33 = arith.constant 0 : index
    %c0_34 = arith.constant 0 : index
    %29 = vector.load %arg15[%c0_32, %c0_33, %c0_34] : memref<2x1x32xf32, #tpu.memory_space<vmem>>, vector<2x1x32xf32>
    tpu.vector_store %arg15[%c0_32, %c0_33, %c0_34], %28 {strides = array<i32>} : memref<2x1x32xf32, #tpu.memory_space<vmem>>, vector<2x1x32xf32>,
    %30 = vector.extract_strided_slice %21 {offsets = [0, 7, 0], sizes = [2, 1, 32], strides = [1, 1, 1]} : vector<2x18x32xf32> to vector<2x1x32xf32>
    %c0_35 = arith.constant 0 : index
    %c0_36 = arith.constant 0 : index
    %c0_37 = arith.constant 0 : index
    %31 = vector.load %arg16[%c0_35, %c0_36, %c0_37] : memref<2x1x32xf32, #tpu.memory_space<vmem>>, vector<2x1x32xf32>
    tpu.vector_store %arg16[%c0_35, %c0_36, %c0_37], %30 {strides = array<i32>} : memref<2x1x32xf32, #tpu.memory_space<vmem>>, vector<2x1x32xf32>,
    %32 = vector.extract_strided_slice %21 {offsets = [0, 8, 0], sizes = [2, 1, 32], strides = [1, 1, 1]} : vector<2x18x32xf32> to vector<2x1x32xf32>
    %c0_38 = arith.constant 0 : index
    %c0_39 = arith.constant 0 : index
    %c0_40 = arith.constant 0 : index
    %33 = vector.load %arg17[%c0_38, %c0_39, %c0_40] : memref<2x1x32xf32, #tpu.memory_space<vmem>>, vector<2x1x32xf32>
    tpu.vector_store %arg17[%c0_38, %c0_39, %c0_40], %32 {strides = array<i32>} : memref<2x1x32xf32, #tpu.memory_space<vmem>>, vector<2x1x32xf32>,
    %34 = vector.extract_strided_slice %21 {offsets = [0, 9, 0], sizes = [2, 1, 32], strides = [1, 1, 1]} : vector<2x18x32xf32> to vector<2x1x32xf32>
    %c0_41 = arith.constant 0 : index
    %c0_42 = arith.constant 0 : index
    %c0_43 = arith.constant 0 : index
    %35 = vector.load %arg18[%c0_41, %c0_42, %c0_43] : memref<2x1x32xf32, #tpu.memory_space<vmem>>, vector<2x1x32xf32>
    tpu.vector_store %arg18[%c0_41, %c0_42, %c0_43], %34 {strides = array<i32>} : memref<2x1x32xf32, #tpu.memory_space<vmem>>, vector<2x1x32xf32>,
    %36 = vector.extract_strided_slice %21 {offsets = [0, 10, 0], sizes = [2, 1, 32], strides = [1, 1, 1]} : vector<2x18x32xf32> to vector<2x1x32xf32>
    %c0_44 = arith.constant 0 : index
    %c0_45 = arith.constant 0 : index
    %c0_46 = arith.constant 0 : index
    %37 = vector.load %arg19[%c0_44, %c0_45, %c0_46] : memref<2x1x32xf32, #tpu.memory_space<vmem>>, vector<2x1x32xf32>
    tpu.vector_store %arg19[%c0_44, %c0_45, %c0_46], %36 {strides = array<i32>} : memref<2x1x32xf32, #tpu.memory_space<vmem>>, vector<2x1x32xf32>,
    %38 = vector.extract_strided_slice %21 {offsets = [0, 11, 0], sizes = [2, 1, 32], strides = [1, 1, 1]} : vector<2x18x32xf32> to vector<2x1x32xf32>
    %c0_47 = arith.constant 0 : index
    %c0_48 = arith.constant 0 : index
    %c0_49 = arith.constant 0 : index
    %39 = vector.load %arg20[%c0_47, %c0_48, %c0_49] : memref<2x1x32xf32, #tpu.memory_space<vmem>>, vector<2x1x32xf32>
    tpu.vector_store %arg20[%c0_47, %c0_48, %c0_49], %38 {strides = array<i32>} : memref<2x1x32xf32, #tpu.memory_space<vmem>>, vector<2x1x32xf32>,
    %40 = vector.extract_strided_slice %21 {offsets = [0, 12, 0], sizes = [2, 1, 32], strides = [1, 1, 1]} : vector<2x18x32xf32> to vector<2x1x32xf32>
    %c0_50 = arith.constant 0 : index
    %c0_51 = arith.constant 0 : index
    %c0_52 = arith.constant 0 : index
    %41 = vector.load %arg21[%c0_50, %c0_51, %c0_52] : memref<2x1x32xf32, #tpu.memory_space<vmem>>, vector<2x1x32xf32>
    tpu.vector_store %arg21[%c0_50, %c0_51, %c0_52], %40 {strides = array<i32>} : memref<2x1x32xf32, #tpu.memory_space<vmem>>, vector<2x1x32xf32>,
    %42 = vector.extract_strided_slice %21 {offsets = [0, 13, 0], sizes = [2, 1, 32], strides = [1, 1, 1]} : vector<2x18x32xf32> to vector<2x1x32xf32>
    %c0_53 = arith.constant 0 : index
    %c0_54 = arith.constant 0 : index
    %c0_55 = arith.constant 0 : index
    %43 = vector.load %arg22[%c0_53, %c0_54, %c0_55] : memref<2x1x32xf32, #tpu.memory_space<vmem>>, vector<2x1x32xf32>
    tpu.vector_store %arg22[%c0_53, %c0_54, %c0_55], %42 {strides = array<i32>} : memref<2x1x32xf32, #tpu.memory_space<vmem>>, vector<2x1x32xf32>,
    %44 = vector.extract_strided_slice %21 {offsets = [0, 14, 0], sizes = [2, 1, 32], strides = [1, 1, 1]} : vector<2x18x32xf32> to vector<2x1x32xf32>
    %c0_56 = arith.constant 0 : index
    %c0_57 = arith.constant 0 : index
    %c0_58 = arith.constant 0 : index
    %45 = vector.load %arg23[%c0_56, %c0_57, %c0_58] : memref<2x1x32xf32, #tpu.memory_space<vmem>>, vector<2x1x32xf32>
    tpu.vector_store %arg23[%c0_56, %c0_57, %c0_58], %44 {strides = array<i32>} : memref<2x1x32xf32, #tpu.memory_space<vmem>>, vector<2x1x32xf32>,
    %46 = vector.extract_strided_slice %21 {offsets = [0, 15, 0], sizes = [2, 1, 32], strides = [1, 1, 1]} : vector<2x18x32xf32> to vector<2x1x32xf32>
    %c0_59 = arith.constant 0 : index
    %c0_60 = arith.constant 0 : index
    %c0_61 = arith.constant 0 : index
    %47 = vector.load %arg24[%c0_59, %c0_60, %c0_61] : memref<2x1x32xf32, #tpu.memory_space<vmem>>, vector<2x1x32xf32>
    tpu.vector_store %arg24[%c0_59, %c0_60, %c0_61], %46 {strides = array<i32>} : memref<2x1x32xf32, #tpu.memory_space<vmem>>, vector<2x1x32xf32>,
    %48 = vector.extract_strided_slice %21 {offsets = [0, 16, 0], sizes = [2, 1, 32], strides = [1, 1, 1]} : vector<2x18x32xf32> to vector<2x1x32xf32>
    %c0_62 = arith.constant 0 : index
    %c0_63 = arith.constant 0 : index
    %c0_64 = arith.constant 0 : index
    %49 = vector.load %arg25[%c0_62, %c0_63, %c0_64] : memref<2x1x32xf32, #tpu.memory_space<vmem>>, vector<2x1x32xf32>
    tpu.vector_store %arg25[%c0_62, %c0_63, %c0_64], %48 {strides = array<i32>} : memref<2x1x32xf32, #tpu.memory_space<vmem>>, vector<2x1x32xf32>,
    %50 = vector.extract_strided_slice %21 {offsets = [0, 17, 0], sizes = [2, 1, 32], strides = [1, 1, 1]} : vector<2x18x32xf32> to vector<2x1x32xf32>
    %c0_65 = arith.constant 0 : index
    %c0_66 = arith.constant 0 : index
    %c0_67 = arith.constant 0 : index
    %51 = vector.load %arg26[%c0_65, %c0_66, %c0_67] : memref<2x1x32xf32, #tpu.memory_space<vmem>>, vector<2x1x32xf32>
    tpu.vector_store %arg26[%c0_65, %c0_66, %c0_67], %50 {strides = array<i32>} : memref<2x1x32xf32, #tpu.memory_space<vmem>>, vector<2x1x32xf32>,
    return
  }
  func.func @transform_0(%arg0: i32) -> (i32, i32) {
    %c0_i32 = arith.constant 0 : i32
    %c0_i32_0 = arith.constant 0 : i32
    %c0_i32_1 = arith.constant 0 : i32
    return %c0_i32, %c0_i32_0 : i32, i32
  }
  func.func @transform_1(%arg0: i32) -> (i32, i32) {
    %c0_i32 = arith.constant 0 : i32
    %c0_i32_0 = arith.constant 0 : i32
    %c0_i32_1 = arith.constant 0 : i32
    return %c0_i32, %c0_i32_0 : i32, i32
  }
  func.func @transform_2(%arg0: i32) -> (i32, i32) {
    %c0_i32 = arith.constant 0 : i32
    %c0_i32_0 = arith.constant 0 : i32
    %c0_i32_1 = arith.constant 0 : i32
    return %c0_i32, %c0_i32_0 : i32, i32
  }
  func.func @transform_3(%arg0: i32) -> (i32, i32) {
    %c0_i32 = arith.constant 0 : i32
    %c0_i32_0 = arith.constant 0 : i32
    %c0_i32_1 = arith.constant 0 : i32
    return %c0_i32, %c0_i32_0 : i32, i32
  }
  func.func @transform_4(%arg0: i32) -> (i32, i32) {
    %c0_i32 = arith.constant 0 : i32
    %c0_i32_0 = arith.constant 0 : i32
    %c0_i32_1 = arith.constant 0 : i32
    return %c0_i32, %c0_i32_0 : i32, i32
  }
  func.func @transform_5(%arg0: i32) -> (i32, i32) {
    %c0_i32 = arith.constant 0 : i32
    %c0_i32_0 = arith.constant 0 : i32
    %c0_i32_1 = arith.constant 0 : i32
    return %c0_i32, %c0_i32_0 : i32, i32
  }
  func.func @transform_6(%arg0: i32) -> (i32, i32, i32) {
    %c0_i32 = arith.constant 0 : i32
    %c0_i32_0 = arith.constant 0 : i32
    %c0_i32_1 = arith.constant 0 : i32
    %c0_i32_2 = arith.constant 0 : i32
    return %c0_i32, %c0_i32_0, %c0_i32_1 : i32, i32, i32
  }
  func.func @transform_7(%arg0: i32) -> (i32, i32) {
    %c0_i32 = arith.constant 0 : i32
    %c0_i32_0 = arith.constant 0 : i32
    %c0_i32_1 = arith.constant 0 : i32
    return %c0_i32, %c0_i32_0 : i32, i32
  }
  func.func @transform_8(%arg0: i32) -> (i32, i32) {
    %c0_i32 = arith.constant 0 : i32
    %c0_i32_0 = arith.constant 0 : i32
    %c0_i32_1 = arith.constant 0 : i32
    return %c0_i32, %c0_i32_0 : i32, i32
  }
  func.func @transform_9(%arg0: i32) -> (i32, i32) {
    %c0_i32 = arith.constant 0 : i32
    %c0_i32_0 = arith.constant 0 : i32
    %c0_i32_1 = arith.constant 0 : i32
    return %c0_i32, %c0_i32_0 : i32, i32
  }
  func.func @transform_10(%arg0: i32) -> (i32, i32) {
    %c0_i32 = arith.constant 0 : i32
    %c0_i32_0 = arith.constant 0 : i32
    %c0_i32_1 = arith.constant 0 : i32
    return %c0_i32, %c0_i32_0 : i32, i32
  }
  func.func @transform_11(%arg0: i32) -> (i32, i32, i32) {
    %c0_i32 = arith.constant 0 : i32
    %c0_i32_0 = arith.constant 0 : i32
    %c0_i32_1 = arith.constant 0 : i32
    %c0_i32_2 = arith.constant 0 : i32
    return %c0_i32, %c0_i32_0, %c0_i32_1 : i32, i32, i32
  }
  func.func @transform_12(%arg0: i32) -> (i32, i32, i32) {
    %c0_i32 = arith.constant 0 : i32
    %c0_i32_0 = arith.constant 0 : i32
    %c0_i32_1 = arith.constant 0 : i32
    %c0_i32_2 = arith.constant 0 : i32
    return %c0_i32, %c0_i32_0, %c0_i32_1 : i32, i32, i32
  }
  func.func @transform_13(%arg0: i32) -> (i32, i32, i32) {
    %c0_i32 = arith.constant 0 : i32
    %c0_i32_0 = arith.constant 0 : i32
    %c0_i32_1 = arith.constant 0 : i32
    %c0_i32_2 = arith.constant 0 : i32
    return %c0_i32, %c0_i32_0, %c0_i32_1 : i32, i32, i32
  }
  func.func @transform_14(%arg0: i32) -> (i32, i32, i32) {
    %c0_i32 = arith.constant 0 : i32
    %c0_i32_0 = arith.constant 0 : i32
    %c0_i32_1 = arith.constant 0 : i32
    %c0_i32_2 = arith.constant 0 : i32
    return %c0_i32, %c0_i32_0, %c0_i32_1 : i32, i32, i32
  }
  func.func @transform_15(%arg0: i32) -> (i32, i32, i32) {
    %c0_i32 = arith.constant 0 : i32
    %c0_i32_0 = arith.constant 0 : i32
    %c0_i32_1 = arith.constant 0 : i32
    %c0_i32_2 = arith.constant 0 : i32
    return %c0_i32, %c0_i32_0, %c0_i32_1 : i32, i32, i32
  }
  func.func @transform_16(%arg0: i32) -> (i32, i32, i32) {
    %c0_i32 = arith.constant 0 : i32
    %c0_i32_0 = arith.constant 0 : i32
    %c0_i32_1 = arith.constant 0 : i32
    %c0_i32_2 = arith.constant 0 : i32
    return %c0_i32, %c0_i32_0, %c0_i32_1 : i32, i32, i32
  }
  func.func @transform_17(%arg0: i32) -> (i32, i32, i32) {
    %c0_i32 = arith.constant 0 : i32
    %c0_i32_0 = arith.constant 0 : i32
    %c0_i32_1 = arith.constant 0 : i32
    %c0_i32_2 = arith.constant 0 : i32
    return %c0_i32, %c0_i32_0, %c0_i32_1 : i32, i32, i32
  }
  func.func @transform_18(%arg0: i32) -> (i32, i32, i32) {
    %c0_i32 = arith.constant 0 : i32
    %c0_i32_0 = arith.constant 0 : i32
    %c0_i32_1 = arith.constant 0 : i32
    %c0_i32_2 = arith.constant 0 : i32
    return %c0_i32, %c0_i32_0, %c0_i32_1 : i32, i32, i32
  }
  func.func @transform_19(%arg0: i32) -> (i32, i32, i32) {
    %c0_i32 = arith.constant 0 : i32
    %c0_i32_0 = arith.constant 0 : i32
    %c0_i32_1 = arith.constant 0 : i32
    %c0_i32_2 = arith.constant 0 : i32
    return %c0_i32, %c0_i32_0, %c0_i32_1 : i32, i32, i32
  }
  func.func @transform_20(%arg0: i32) -> (i32, i32, i32) {
    %c0_i32 = arith.constant 0 : i32
    %c0_i32_0 = arith.constant 0 : i32
    %c0_i32_1 = arith.constant 0 : i32
    %c0_i32_2 = arith.constant 0 : i32
    return %c0_i32, %c0_i32_0, %c0_i32_1 : i32, i32, i32
  }
  func.func @transform_21(%arg0: i32) -> (i32, i32, i32) {
    %c0_i32 = arith.constant 0 : i32
    %c0_i32_0 = arith.constant 0 : i32
    %c0_i32_1 = arith.constant 0 : i32
    %c0_i32_2 = arith.constant 0 : i32
    return %c0_i32, %c0_i32_0, %c0_i32_1 : i32, i32, i32
  }
  func.func @transform_22(%arg0: i32) -> (i32, i32, i32) {
    %c0_i32 = arith.constant 0 : i32
    %c0_i32_0 = arith.constant 0 : i32
    %c0_i32_1 = arith.constant 0 : i32
    %c0_i32_2 = arith.constant 0 : i32
    return %c0_i32, %c0_i32_0, %c0_i32_1 : i32, i32, i32
  }
  func.func @transform_23(%arg0: i32) -> (i32, i32, i32) {
    %c0_i32 = arith.constant 0 : i32
    %c0_i32_0 = arith.constant 0 : i32
    %c0_i32_1 = arith.constant 0 : i32
    %c0_i32_2 = arith.constant 0 : i32
    return %c0_i32, %c0_i32_0, %c0_i32_1 : i32, i32, i32
  }
  func.func @transform_24(%arg0: i32) -> (i32, i32, i32) {
    %c0_i32 = arith.constant 0 : i32
    %c0_i32_0 = arith.constant 0 : i32
    %c0_i32_1 = arith.constant 0 : i32
    %c0_i32_2 = arith.constant 0 : i32
    return %c0_i32, %c0_i32_0, %c0_i32_1 : i32, i32, i32
  }
  func.func @transform_25(%arg0: i32) -> (i32, i32, i32) {
    %c0_i32 = arith.constant 0 : i32
    %c0_i32_0 = arith.constant 0 : i32
    %c0_i32_1 = arith.constant 0 : i32
    %c0_i32_2 = arith.constant 0 : i32
    return %c0_i32, %c0_i32_0, %c0_i32_1 : i32, i32, i32
  }
}

</mosaic_0001>

<bundles_post_ra>
// kernel: tile.14
= control target key start
LH: loop header
LB: loop body
LE: loop exit
PB: predicated region body
PF: predicated region fallthrough
CT: control target
= control target key end

     0   :  { %vm3_vm0 = vcmask 261120   ;;  %s11_s6 = smov 3  ;;  %s74_s0 = inlined_call_operand.vmem [shape: f32[2,17,32], index: 0, kind: input, shape index: {}]   ;;  %s75_s1 = inlined_call_operand.vmem [shape: f32[34,32], index: 1, kind: output, shape index: {}]  }
   0x1   :  { %v2_v0 = vld [vmem:[%s74_s0] sm:$0xff]   ;;  %v26_v1 = vld [vmem:[%s74_s0 + $0x8] sm:$0xff]  }
   0x2   :  { %v28_v2 = vld [vmem:[%s74_s0 + $0x10] ss:$8 sm:%s11_s6]   ;;  %4 = vst.msk [vmem:[%s75_s1] sm:$0xff] %vm3_vm0, %v2_v0  }
   0x3   :  { %v30_v3 = vld [vmem:[%s74_s0 + $0x19] sm:$0xff]   ;;  %27 = vst.msk [vmem:[%s75_s1 + $0x8] sm:$0xff] %vm3_vm0, %v26_v1   ;;  %v32_v4 = vld [vmem:[%s74_s0 + $0x21] sm:$0xff]  }
   0x4   :  { %29 = vst.msk [vmem:[%s75_s1 + $0x10] sm:$0x3] %vm3_vm0, %v28_v2  }
   0x5   :  { %31 = vst.msk [vmem:[%s75_s1 + $0x12] sm:$0xff] %vm3_vm0, %v30_v3  }
   0x6   :  { %33 = vst.msk [vmem:[%s75_s1 + $0x1a] sm:$0xff] %vm3_vm0, %v32_v4  }

// kernel: embeddings_forward.1
= control target key start
LH: loop header
LB: loop body
LE: loop exit
PB: predicated region body
PF: predicated region fallthrough
CT: control target
= control target key end

     0   :  { %s2051_s0 = inlined_call_operand.vmem [shape: f32[34,48], index: 0, kind: input, shape index: {}]   ;;  %s2052_s1 = inlined_call_operand.vmem [shape: f32[48,32], index: 1, kind: input, shape index: {}]   ;;  %s2053_s2 = inlined_call_operand.vmem [shape: f32[34,32], index: 2, kind: input, shape index: {}]   ;;  %s2054_s3 = inlined_call_operand.vmem [shape: f32[16,768], index: 3, kind: input, shape index: {}]   ;;  %s2055_s4 = inlined_call_operand.vmem [shape: f32[768,32], index: 4, kind: input, shape index: {}]   ;;  %s2056_s5 = inlined_call_operand.vmem [shape: f32[16,32], index: 5, kind: input, shape index: {}]   ;;  %s2057_s6 = inlined_call_operand.vmem [shape: f32[2,18,1], index: 6, kind: input, shape index: {}]   ;;  %s2058_s7 = inlined_call_operand.vmem [shape: f32[18,32], index: 7, kind: input, shape index: {}]   ;;  %s2059_s8 = inlined_call_operand.vmem [shape: f32[18,32], index: 8, kind: input, shape index: {}]   ;;  %s2060_s9 = inlined_call_operand.vmem [shape: f32[34,32], index: 9, kind: output, shape index: {0}]   ;;  %s2061_s10 = inlined_call_operand.hbm [shape: f32[16,32], index: 10, kind: output, shape index: {1}]   ;;  %s2062_s11 = inlined_call_operand.hbm [shape: f32[2,4,32], index: 11, kind: output, shape index: {2}]   ;;  %s2063_s12 = inlined_call_operand.hbm [shape: f32[2,1,32], index: 12, kind: output, shape index: {3}]   ;;  %s2064_s13 = inlined_call_operand.hbm [shape: f32[2,1,32], index: 13, kind: output, shape index: {4}]   ;;  %s2065_s14 = inlined_call_operand.hbm [shape: f32[2,1,32], index: 14, kind: output, shape index: {5}]   ;;  %s2066_s15 = inlined_call_operand.hbm [shape: f32[2,1,32], index: 15, kind: output, shape index: {6}]   ;;  %s2067_s16 = inlined_call_operand.hbm [shape: f32[2,1,32], index: 16, kind: output, shape index: {7}]   ;;  %s2068_s17 = inlined_call_operand.hbm [shape: f32[2,1,32], index: 17, kind: output, shape index: {8}]   ;;  %s2069_s18 = inlined_call_operand.hbm [shape: f32[2,1,32], index: 18, kind: output, shape index: {9}]   ;;  %s2070_s19 = inlined_call_operand.hbm [shape: f32[2,1,32], index: 19, kind: output, shape index: {10}]   ;;  %s2071_s20 = inlined_call_operand.hbm [shape: f32[2,1,32], index: 20, kind: output, shape index: {11}]   ;;  %s2072_s21 = inlined_call_operand.hbm [shape: f32[2,1,32], index: 21, kind: output, shape index: {12}]   ;;  %s2073_s22 = inlined_call_operand.hbm [shape: f32[2,1,32], index: 22, kind: output, shape index: {13}]   ;;  %s2074_s23 = inlined_call_operand.hbm [shape: f32[2,1,32], index: 23, kind: output, shape index: {14}]   ;;  %s2075_s24 = inlined_call_operand.hbm [shape: f32[2,1,32], index: 24, kind: output, shape index: {15}]   ;;  %s2076_s25 = inlined_call_operand.hbm [shape: f32[2,1,32], index: 25, kind: output, shape index: {16}]  }
   0x1   :  { %2093 = sst [smem:[#allocation42_spill]] %s2051_s0 }
   0x2   :  { %2094 = sst [smem:[#allocation43_spill]] %s2052_s1 }
   0x3   :  { %2095 = sst [smem:[#allocation44_spill]] %s2053_s2 }
   0x4   :  { %2096 = sst [smem:[#allocation45_spill]] %s2054_s3 }
   0x5   :  { %2097 = sst [smem:[#allocation46_spill]] %s2055_s4 }
   0x6   :  { %2098 = sst [smem:[#allocation47_spill]] %s2056_s5 }
   0x7   :  { %2099 = sst [smem:[#allocation48_spill]] %s2057_s6 }
   0x8   :  { %2100 = sst [smem:[#allocation49_spill]] %s2058_s7 }
   0x9   :  { %2101 = sst [smem:[#allocation50_spill]] %s2059_s8 }
   0xa   :  { %2102 = sst [smem:[#allocation51_spill]] %s2060_s9 }
   0xb   :  { %2103 = sst [smem:[#allocation52_spill]] %s2069_s18 }
   0xc   :  { %2104 = sst [smem:[#allocation53_spill]] %s2073_s22 }
   0xd   :  { %2105 = sst [smem:[#allocation54_spill]] %s2075_s24 }
   0xe   :  { %31 = vsyncpa [#allocation3], 0 }
   0xf   :  { %32 = vsyncpa [#allocation5], 0 }
  0x10   :  { %33 = vsyncpa [#allocation8], 0 }
  0x11   :  { %34 = vsyncpa [#allocation11], 0 }
  0x12   :  { %35 = vsyncpa [#allocation14], 0 }
  0x13   :  { %36 = vsyncpa [#allocation17], 0 }
  0x14   :  { %37 = vsyncpa [#allocation20], 0 }
  0x15   :  { %38 = vsyncpa [#allocation23], 0  ;;  %s2106_s6 = sld [smem:[#allocation46_spill]]  ;;  %vm74_vm0 = vcmask 392192  }
  0x16   :  { %s2107_s1 = sld [smem:[#allocation43_spill]] }
  0x17   :  { %s2108_s28 = sld [smem:[#allocation42_spill]] }
  0x1b   :  { %v156_v0 = vld [vmem:[%s2106_s6 + $0x78] sm:$0xff]  ;;  %v155_v3 = vld [vmem:[%s2106_s6 + $0x70] sm:$0xff]  ;;  %v154_v6 = vld [vmem:[%s2106_s6 + $0x68] sm:$0xff] }
  0x1c   :  { %v172_v1 = vld [vmem:[%s2106_s6 + $0xf8] sm:$0xff]  ;;  %239 = vmatpush.msra.mxu1 %v156_v0  ;;  %v171_v4 = vld [vmem:[%s2106_s6 + $0xf0] sm:$0xff]  ;;  %v170_v7 = vld [vmem:[%s2106_s6 + $0xe8] sm:$0xff] }
  0x1d   :  { %v188_v2 = vld [vmem:[%s2106_s6 + $0x178] sm:$0xff]  ;;  %262 = vmatpush.msra.mxu2 %v172_v1  ;;  %v187_v5 = vld [vmem:[%s2106_s6 + $0x170] sm:$0xff]  ;;  %v186_v8 = vld [vmem:[%s2106_s6 + $0x168] sm:$0xff] }
  0x1e   :  { %285 = vmatpush.msra.mxu3 %v188_v2  ;;  %240 = vmatpush.msra.mxu1 %v155_v3  ;;  %v68_v9 = vld [vmem:[%s2107_s1 + $0x28] sm:$0xff]  ;;  %v153_v10 = vld [vmem:[%s2106_s6 + $0x60] sm:$0xff]  ;;  %v66_v14 = vld [vmem:[%s2107_s1 + $0x18] sm:$0xff] }
  0x1f   :  { %263 = vmatpush.msra.mxu2 %v171_v4  ;;  %100 = vmatpush.msra.mxu0 %v68_v9  ;;  %v169_v11 = vld [vmem:[%s2106_s6 + $0xe0] sm:$0xff]  ;;  %v152_v15 = vld [vmem:[%s2106_s6 + $0x58] sm:$0xff]  ;;  %v65_v18 = vld [vmem:[%s2107_s1 + $0x10] sm:$0xff] }
  0x20   :  { %286 = vmatpush.msra.mxu3 %v187_v5  ;;  %v67_v12 = vld [vmem:[%s2107_s1 + $0x20] sm:$0xff]  ;;  %241 = vmatpush.msra.mxu1 %v154_v6  ;;  %v168_v16 = vld [vmem:[%s2106_s6 + $0xd8] sm:$0xff]  ;;  %v151_v19 = vld [vmem:[%s2106_s6 + $0x50] sm:$0xff] }
  0x21   :  { %264 = vmatpush.msra.mxu2 %v170_v7  ;;  %v185_v13 = vld [vmem:[%s2106_s6 + $0x160] sm:$0xff]  ;;  %101 = vmatpush.msra.mxu0 %v67_v12  ;;  %v184_v17 = vld [vmem:[%s2106_s6 + $0x158] sm:$0xff]  ;;  %v167_v20 = vld [vmem:[%s2106_s6 + $0xd0] sm:$0xff] }
  0x22   :  { %287 = vmatpush.msra.mxu3 %v186_v8  ;;  %242 = vmatpush.msra.mxu1 %v153_v10  ;;  %v183_v21 = vld [vmem:[%s2106_s6 + $0x150] sm:$0xff]  ;;  %v64_v22 = vld [vmem:[%s2107_s1 + $0x8] sm:$0xff]  ;;  %v63_v26 = vld [vmem:[%s2107_s1] sm:$0xff] }
  0x23   :  { %265 = vmatpush.msra.mxu2 %v169_v11  ;;  %102 = vmatpush.msra.mxu0 %v66_v14  ;;  %v150_v23 = vld [vmem:[%s2106_s6 + $0x48] sm:$0xff]  ;;  %v149_v27 = vld [vmem:[%s2106_s6 + $0x40] sm:$0xff]  ;;  %v148_v31 = vld [vmem:[%s2106_s6 + $0x38] sm:$0xff] }
  0x24   :  { %288 = vmatpush.msra.mxu3 %v185_v13  ;;  %243 = vmatpush.msra.mxu1 %v152_v15  ;;  %v166_v24 = vld [vmem:[%s2106_s6 + $0xc8] sm:$0xff]  ;;  %v165_v28 = vld [vmem:[%s2106_s6 + $0xc0] sm:$0xff]  ;;  %v164_v32 = vld [vmem:[%s2106_s6 + $0xb8] sm:$0xff] }
  0x25   :  { %266 = vmatpush.msra.mxu2 %v168_v16  ;;  %103 = vmatpush.msra.mxu0 %v65_v18  ;;  %v182_v25 = vld [vmem:[%s2106_s6 + $0x148] sm:$0xff]  ;;  %v181_v29 = vld [vmem:[%s2106_s6 + $0x140] sm:$0xff]  ;;  %v180_v33 = vld [vmem:[%s2106_s6 + $0x138] sm:$0xff] }
  0x26   :  { %289 = vmatpush.msra.mxu3 %v184_v17  ;;  %244 = vmatpush.msra.mxu1 %v151_v19  ;;  %v58_v30 = vld [vmem:[%s2108_s28] sm:$0xff]  ;;  %v204_v34 = vld [vmem:[%s2106_s6 + $0x1f8] sm:$0xff]  ;;  %v147_v35 = vld [vmem:[%s2106_s6 + $0x30] sm:$0xff] }
  0x27   :  { %267 = vmatpush.msra.mxu2 %v167_v20  ;;  %104 = vmatpush.msra.mxu0 %v64_v22  ;;  %v163_v36 = vld [vmem:[%s2106_s6 + $0xb0] sm:$0xff]  ;;  %v146_v39 = vld [vmem:[%s2106_s6 + $0x28] sm:$0xff]  ;;  %v145_v43 = vld [vmem:[%s2106_s6 + $0x20] sm:$0xff] }
  0x28   :  { %290 = vmatpush.msra.mxu3 %v183_v21  ;;  %245 = vmatpush.msra.mxu1 %v150_v23  ;;  %v179_v37 = vld [vmem:[%s2106_s6 + $0x130] sm:$0xff]  ;;  %v162_v40 = vld [vmem:[%s2106_s6 + $0xa8] sm:$0xff]  ;;  %v161_v44 = vld [vmem:[%s2106_s6 + $0xa0] sm:$0xff] }
  0x29   :  { %268 = vmatpush.msra.mxu2 %v166_v24  ;;  %105 = vmatpush.msra.mxu0 %v63_v26  ;;  %v203_v38 = vld [vmem:[%s2106_s6 + $0x1f0] sm:$0xff]  ;;  %v178_v41 = vld [vmem:[%s2106_s6 + $0x128] sm:$0xff]  ;;  %v177_v45 = vld [vmem:[%s2106_s6 + $0x120] sm:$0xff] }
  0x2a   :  { %291 = vmatpush.msra.mxu3 %v182_v25  ;;  %246 = vmatpush.msra.mxu1 %v149_v27  ;;  %v202_v42 = vld [vmem:[%s2106_s6 + $0x1e8] sm:$0xff]  ;;  %v144_v47 = vld [vmem:[%s2106_s6 + $0x18] sm:$0xff]  ;;  %v201_v50 = vld [vmem:[%s2106_s6 + $0x1e0] sm:$0xff] }
  0x2b   :  { %269 = vmatpush.msra.mxu2 %v165_v28  ;;  %757 = vmatmul.msk.f32.vlgmr.msra.gmra.mxu0 %vm74_vm0, %v58_v30  ;;  %v59_v46 = vld [vmem:[%s2108_s28 + $0x8] sm:$0xff]  ;;  %v160_v48 = vld [vmem:[%s2106_s6 + $0x98] sm:$0xff]  ;;  %v143_v51 = vld [vmem:[%s2106_s6 + $0x10] sm:$0xff] }
  0x2c   :  { %292 = vmatpush.msra.mxu3 %v181_v29  ;;  %247 = vmatpush.msra.mxu1 %v148_v31  ;;  %v176_v49 = vld [vmem:[%s2106_s6 + $0x118] sm:$0xff]  ;;  %v159_v52 = vld [vmem:[%s2106_s6 + $0x90] sm:$0xff]  ;;  %v142_v55 = vld [vmem:[%s2106_s6 + $0x8] sm:$0xff] }
  0x2d   :  { %270 = vmatpush.msra.mxu2 %v164_v32  ;;  %308 = vmatpush.msrb.mxu0 %v204_v34  ;;  %v175_v53 = vld [vmem:[%s2106_s6 + $0x110] sm:$0xff]  ;;  %v200_v54 = vld [vmem:[%s2106_s6 + $0x1d8] sm:$0xff]  ;;  %v158_v56 = vld [vmem:[%s2106_s6 + $0x88] sm:$0xff] }
  0x2e   :  { %293 = vmatpush.msra.mxu3 %v180_v33  ;;  %248 = vmatpush.msra.mxu1 %v147_v35  ;;  %v174_v57 = vld [vmem:[%s2106_s6 + $0x108] sm:$0xff]  ;;  %v199_v58 = vld [vmem:[%s2106_s6 + $0x1d0] sm:$0xff]  ;;  %v141_v59 = vld [vmem:[%s2106_s6] sm:$0xff] }
  0x2f   :  { %271 = vmatpush.msra.mxu2 %v163_v36  ;;  %309 = vmatpush.msrb.mxu0 %v203_v38  ;;  %v157_v60 = vld [vmem:[%s2106_s6 + $0x80] sm:$0xff]  ;;  %v220_v62 = vld [vmem:[%s2106_s6 + $0x278] sm:$0xff]  ;;  %v60_v0 = vld [vmem:[%s2108_s28 + $0x10] sm:$0xff] }
  0x30   :  { %294 = vmatpush.msra.mxu3 %v179_v37  ;;  %249 = vmatpush.msra.mxu1 %v146_v39  ;;  %v173_v61 = vld [vmem:[%s2106_s6 + $0x100] sm:$0xff]  ;;  %v236_v63 = vld [vmem:[%s2106_s6 + $0x2f8] sm:$0xff]  ;;  %v219_v1 = vld [vmem:[%s2106_s6 + $0x270] sm:$0xff] }
  0x31   :  { %272 = vmatpush.msra.mxu2 %v162_v40  ;;  %310 = vmatpush.msrb.mxu0 %v202_v42  ;;  %v235_v2 = vld [vmem:[%s2106_s6 + $0x2f0] sm:$0xff]  ;;  %v218_v3 = vld [vmem:[%s2106_s6 + $0x268] sm:$0xff]  ;;  %v217_v6 = vld [vmem:[%s2106_s6 + $0x260] sm:$0xff] }
  0x32   :  { %295 = vmatpush.msra.mxu3 %v178_v41  ;;  %250 = vmatpush.msra.mxu1 %v145_v43  ;;  %v198_v4 = vld [vmem:[%s2106_s6 + $0x1c8] sm:$0xff]  ;;  %v197_v7 = vld [vmem:[%s2106_s6 + $0x1c0] sm:$0xff]  ;;  %v216_v9 = vld [vmem:[%s2106_s6 + $0x258] sm:$0xff] }
  0x33   :  { %273 = vmatpush.msra.mxu2 %v161_v44  ;;  %758 = vmatmul.msk.f32.gmra.mxu0 %vm74_vm0, %v59_v46  ;;  %v234_v5 = vld [vmem:[%s2106_s6 + $0x2e8] sm:$0xff]  ;;  %v233_v8 = vld [vmem:[%s2106_s6 + $0x2e0] sm:$0xff]  ;;  %v196_v10 = vld [vmem:[%s2106_s6 + $0x1b8] sm:$0xff] }
  0x34   :  { %296 = vmatpush.msra.mxu3 %v177_v45  ;;  %251 = vmatpush.msra.mxu1 %v144_v47  ;;  %v232_v11 = vld [vmem:[%s2106_s6 + $0x2d8] sm:$0xff]  ;;  %v215_v13 = vld [vmem:[%s2106_s6 + $0x250] sm:$0xff] }
  0x35   :  { %274 = vmatpush.msra.mxu2 %v160_v48  ;;  %311 = vmatpush.msrb.mxu0 %v201_v50  ;;  %v61_v12 = vld [vmem:[%s2108_s28 + $0x18] sm:$0xff]  ;;  %v231_v14 = vld [vmem:[%s2106_s6 + $0x2d0] sm:$0xff] }
  0x36   :  { %297 = vmatpush.msra.mxu3 %v176_v49  ;;  %252 = vmatpush.msra.mxu1 %v143_v51 }
  0x37   :  { %275 = vmatpush.msra.mxu2 %v159_v52  ;;  %312 = vmatpush.msrb.mxu0 %v200_v54 }
  0x38   :  { %298 = vmatpush.msra.mxu3 %v175_v53  ;;  %253 = vmatpush.msra.mxu1 %v142_v55 }
  0x39   :  { %276 = vmatpush.msra.mxu2 %v158_v56  ;;  %313 = vmatpush.msrb.mxu0 %v199_v58 }
  0x3a   :  { %299 = vmatpush.msra.mxu3 %v174_v57  ;;  %254 = vmatpush.msra.mxu1 %v141_v59 }
  0x3b   :  { %277 = vmatpush.msra.mxu2 %v157_v60  ;;  %759 = vmatmul.msk.f32.gmra.mxu0 %vm74_vm0, %v60_v0 }
  0x3c   :  { %300 = vmatpush.msra.mxu3 %v173_v61  ;;  %331 = vmatpush.msrb.mxu1 %v220_v62 }
  0x3d   :  { %354 = vmatpush.msrb.mxu2 %v236_v63  ;;  %314 = vmatpush.msrb.mxu0 %v198_v4 }
  0x3e   :  { %762 = vmatpush.msrb.mxu3 %v220_v62  ;;  %332 = vmatpush.msrb.mxu1 %v219_v1 }
  0x3f   :  { %355 = vmatpush.msrb.mxu2 %v235_v2  ;;  %315 = vmatpush.msrb.mxu0 %v197_v7 }
  0x40   :  { %763 = vmatpush.msrb.mxu3 %v219_v1  ;;  %333 = vmatpush.msrb.mxu1 %v218_v3 }
  0x41   :  { %356 = vmatpush.msrb.mxu2 %v234_v5  ;;  %316 = vmatpush.msrb.mxu0 %v196_v10 }
  0x42   :  { %764 = vmatpush.msrb.mxu3 %v218_v3  ;;  %334 = vmatpush.msrb.mxu1 %v217_v6 }
  0x43   :  { %357 = vmatpush.msrb.mxu2 %v233_v8 }
  0x44   :  { %765 = vmatpush.msrb.mxu3 %v217_v6  ;;  %335 = vmatpush.msrb.mxu1 %v216_v9 }
  0x45   :  { %39 = vsyncpa [#allocation26], 0  ;;  %358 = vmatpush.msrb.mxu2 %v232_v11  ;;  %v195_v15 = vld [vmem:[%s2106_s6 + $0x1b0] sm:$0xff]  ;;  %v214_v16 = vld [vmem:[%s2106_s6 + $0x248] sm:$0xff]  ;;  %760 = vmatmul.msk.f32.gmra.mxu0 %vm74_vm0, %v61_v12  ;;  %s2109_s30 = sld [smem:[#allocation45_spill]]  ;;  %v1206_v49 = vmov 0  }
  0x46   :  { %766 = vmatpush.msrb.mxu3 %v216_v9  ;;  %336 = vmatpush.msrb.mxu1 %v215_v13  ;;  %v230_v17 = vld [vmem:[%s2106_s6 + $0x2c8] sm:$0xff]  ;;  %v213_v19 = vld [vmem:[%s2106_s6 + $0x240] sm:$0xff]  ;;  %v212_v25 = vld [vmem:[%s2106_s6 + $0x238] sm:$0xff]  ;;  %s2110_s3 = sld [smem:[#allocation48_spill]]  ;;  %vm122_vm1 = vcmask 261120   ;;  %s1207_s5 = smov [#allocation4]  }
  0x47   :  { %359 = vmatpush.msrb.mxu2 %v231_v14  ;;  %v194_v18 = vld [vmem:[%s2106_s6 + $0x1a8] sm:$0xff]  ;;  %317 = vmatpush.msrb.mxu0 %v195_v15  ;;  %v229_v20 = vld [vmem:[%s2106_s6 + $0x2c0] sm:$0xff]  ;;  %v228_v26 = vld [vmem:[%s2106_s6 + $0x2b8] sm:$0xff]  ;;  %s2111_s8 = sld [smem:[#allocation44_spill]]  ;;  %s1753_s0 = sshll.u32 %s1207_s5, 4  ;;  %vm448_vm2 = vcmask 253952  }
  0x48   :  { %767 = vmatpush.msrb.mxu3 %v215_v13  ;;  %337 = vmatpush.msrb.mxu1 %v214_v16  ;;  %v193_v24 = vld [vmem:[%s2106_s6 + $0x1a0] sm:$0xff]  ;;  %v192_v28 = vld [vmem:[%s2106_s6 + $0x198] sm:$0xff]  ;;  %v211_v29 = vld [vmem:[%s2106_s6 + $0x230] sm:$0xff]  ;;  %s2112_s4 = sld [smem:[#allocation51_spill]]  ;;  %s1208_s29 = smov [#allocation7]   ;;  %vm451_vm3 = vcmask 254977  }
  0x49   :  { %360 = vmatpush.msrb.mxu2 %v230_v17  ;;  %318 = vmatpush.msrb.mxu0 %v194_v18  ;;  %v62_v27 = vld [vmem:[%s2108_s28 + $0x20] sm:$0x3]  ;;  %v227_v30 = vld [vmem:[%s2106_s6 + $0x2b0] sm:$0xff]  ;;  %v210_v32 = vld [vmem:[%s2106_s6 + $0x228] sm:$0xff]  ;;  %2113 = sst [smem:[#allocation36_spill]] %s1753_s0  ;;  %s1774_s2 = sshll.u32 %s1208_s29, 4 }
  0x4a   :  { %768 = vmatpush.msrb.mxu3 %v214_v16  ;;  %338 = vmatpush.msrb.mxu1 %v213_v19  ;;  %v191_v31 = vld [vmem:[%s2106_s6 + $0x190] sm:$0xff]  ;;  %v226_v33 = vld [vmem:[%s2106_s6 + $0x2a8] sm:$0xff]  ;;  %v209_v35 = vld [vmem:[%s2106_s6 + $0x220] sm:$0xff]  ;;  %s2114_s28 = sld [smem:[#allocation49_spill]]  ;;  %s545_s1 = sshll.u32 %s2066_s15, 4  ;;  %vm127_vm4 = vcmask 254976   ;;  %s1791_s1 = int_to_ptr.hbm [resolvable:$true] %s545_s1 }
  0x4b   :  { %v129_v21 = vld [vmem:[%s2109_s30] sm:$0xff]  ;;  %v130_v22 = vld [vmem:[%s2109_s30 + $0x8] sm:$0xff]  ;;  %v131_v23 = vld [vmem:[%s2109_s30 + $0x10] sm:$0xff]  ;;  %361 = vmatpush.msrb.mxu2 %v229_v20  ;;  %319 = vmatpush.msrb.mxu0 %v193_v24  ;;  %s2115_s9 = sld [smem:[#allocation50_spill]]  ;;  %s571_s7 = sshll.u32 %s2068_s17, 4  ;;  %vm433_vm5 = vcmask 257024   ;;  %s1813_s7 = int_to_ptr.hbm [resolvable:$true] %s571_s7 }
  0x4c   :  { %769 = vmatpush.msrb.mxu3 %v213_v19  ;;  %255 = vmatmul.f32.vlgmr.msra.gmra.mxu1 %v129_v21  ;;  %v190_v34 = vld [vmem:[%s2106_s6 + $0x188] sm:$0xff]  ;;  %v225_v36 = vld [vmem:[%s2106_s6 + $0x2a0] sm:$0xff]  ;;  %v135_v37 = vld [vmem:[%s2109_s30 + $0x30] sm:$0xff]  ;;  %2116 = sst [smem:[#allocation37_spill]] %s1774_s2  ;;  %s675_s24 = sshll.u32 %s2076_s25, 4  ;;  %vm439_vm6 = vcmask 259077   ;;  %s676_s24 = int_to_ptr.hbm [resolvable:$true] %s675_s24 }
  0x4d   :  { %278 = vmatmul.f32.vlgmr.msra.gmra.mxu2 %v130_v22  ;;  %301 = vmatmul.f32.vlgmr.msra.gmra.mxu3 %v131_v23  ;;  %v136_v38 = vld [vmem:[%s2109_s30 + $0x38] sm:$0xff]  ;;  %v137_v39 = vld [vmem:[%s2109_s30 + $0x40] sm:$0xff]  ;;  %v207_v44 = vld [vmem:[%s2106_s6 + $0x210] sm:$0xff]  ;;  %s1212_s15 = smov [#allocation16]   ;;  %s1214_s25 = smov 16   ;;  %vm445_vm7 = vcmask 261127  }
  0x4e   :  { %339 = vmatpush.msrb.mxu1 %v212_v25  ;;  %770 = vmatpush.msrb.mxu3 %v212_v25  ;;  %v189_v40 = vld [vmem:[%s2106_s6 + $0x180] sm:$0xff]  ;;  %v208_v41 = vld [vmem:[%s2106_s6 + $0x218] sm:$0xff]  ;;  %v223_v45 = vld [vmem:[%s2106_s6 + $0x290] sm:$0xff]  ;;  %s1811_s17 = sshll.u32 %s1212_s15, 4  ;;  %s1215_s26 = smov 1   ;;  %vm436_vm8 = vcmask 258052  }
  0x4f   :  { %362 = vmatpush.msrb.mxu2 %v228_v26  ;;  %761 = vmatmul.msk.f32.gmra.mxu0 %vm74_vm0, %v62_v27  ;;  %v224_v42 = vld [vmem:[%s2106_s6 + $0x298] sm:$0xff]  ;;  %v206_v46 = vld [vmem:[%s2106_s6 + $0x208] sm:$0xff]  ;;  %v205_v48 = vld [vmem:[%s2106_s6 + $0x200] sm:$0xff]  ;;  %2119 = sst [smem:[#allocation40_spill]] %s1811_s17  ;;  %s649_s15 = sshll.u32 %s2074_s23, 4  ;;  %vm457_vm9 = vcmask 257027   ;;  %s1847_s15 = int_to_ptr.hbm [resolvable:$true] %s649_s15 }
  0x50   :  { %320 = vmatpush.msrb.mxu0 %v192_v28  ;;  %340 = vmatpush.msrb.mxu1 %v211_v29  ;;  %v132_v43 = vld [vmem:[%s2109_s30 + $0x18] sm:$0xff]  ;;  %v222_v47 = vld [vmem:[%s2106_s6 + $0x288] sm:$0xff]  ;;  %v221_v50 = vld [vmem:[%s2106_s6 + $0x280] sm:$0xff]  ;;  %s493_s6 = sshll.u32 %s2062_s11, 4  ;;  %s623_s11 = sshll.u32 %s2072_s21, 4  ;;  %vm442_vm10 = vcmask 260102   ;;  %s1765_s6 = int_to_ptr.hbm [resolvable:$true] %s493_s6  ;;  %s1845_s11 = int_to_ptr.hbm [resolvable:$true] %s623_s11 }
  0x51   :  { %771 = vmatpush.msrb.mxu3 %v211_v29  ;;  %363 = vmatpush.msrb.mxu2 %v227_v30  ;;  %v133_v51 = vld [vmem:[%s2109_s30 + $0x20] sm:$0xff]  ;;  %v139_v52 = vld [vmem:[%s2109_s30 + $0x50] sm:$0xff]  ;;  %v134_v53 = vld [vmem:[%s2109_s30 + $0x28] sm:$0xff]  ;;  %s480_s21 = sshll.u32 %s2061_s10, 4  ;;  %s2121_s5 = sld [smem:[#allocation47_spill]]  ;;  %vm454_vm11 = vcmask 256002   ;;  %s1857_s21 = int_to_ptr.hbm [resolvable:$true] %s480_s21 }
  0x52   :  { %321 = vmatpush.msrb.mxu0 %v191_v31  ;;  %341 = vmatpush.msrb.mxu1 %v210_v32  ;;  %v138_v54 = vld [vmem:[%s2109_s30 + $0x48] sm:$0xff]  ;;  %v382_v55 = vld [vmem:[%s2110_s3 + $0x18] sm:$0xff]  ;;  %v379_v56 = vld [vmem:[%s2110_s3] sm:$0xff]  ;;  %s1218_s10 = smov [#allocation6]   ;;  %s1219_s23 = smov [#allocation9]  }
  0x53   :  { %772 = vmatpush.msrb.mxu3 %v210_v32  ;;  %364 = vmatpush.msrb.mxu2 %v226_v33  ;;  %v381_v57 = vld [vmem:[%s2110_s3 + $0x10] sm:$0x3]  ;;  %v140_v58 = vld [vmem:[%s2109_s30 + $0x58] sm:$0xff]  ;;  %v383_v59 = vld [vmem:[%s2110_s3 + $0x20] sm:$0xff]  ;;  %s519_s30 = sshll.u32 %s2064_s13, 4  ;;  %s1210_s13 = smov [#allocation13]   ;;  %s1788_s30 = int_to_ptr.hbm [resolvable:$true] %s519_s30 }
  0x54   :  { %322 = vmatpush.msrb.mxu0 %v190_v34  ;;  %342 = vmatpush.msrb.mxu1 %v209_v35  ;;  %v380_v60 = vld [vmem:[%s2110_s3 + $0x8] sm:$0xff]  ;;  %v69_v62 = vld [vmem:[%s2111_s8] sm:$0xff]  ;;  %v71_v4 = vld [vmem:[%s2111_s8 + $0x10] sm:$0xff]  ;;  %s1793_s0 = sshll.u32 %s1210_s13, 4  ;;  %s1211_s13 = smov [#allocation25]  }
  0x55   :  { %773 = vmatpush.msrb.mxu3 %v209_v35  ;;  %365 = vmatpush.msrb.mxu2 %v225_v36  ;;  %v384_v61 = vld [vmem:[%s2110_s3 + $0x28] sm:$0x3]  ;;  %v387_v6 = vld [vmem:[%s2114_s28 + $0x10] sm:$0x3]  ;;  %s1209_s3 = smov [#allocation10]   ;;  %v72_v12 = vld [vmem:[%s2111_s8 + $0x18] sm:$0xff] }
  0x56   :  { %258 = vmatmul.f32.gmra.mxu1 %v135_v37  ;;  %281 = vmatmul.f32.gmra.mxu2 %v136_v38  ;;  %v70_v1 = vld [vmem:[%s2111_s8 + $0x8] sm:$0xff]  ;;  %v426_v8 = vld [vmem:[%s2115_s9 + $0x10] sm:$0x3]  ;;  %s1782_s18 = sshll.u32 %s1209_s3, 4  ;;  %2118 = sst [smem:[#allocation39_spill]] %s1793_s0  ;;  %v385_v24 = vld [vmem:[%s2114_s28] sm:$0xff] }
  0x57   :  { %304 = vmatmul.f32.gmra.mxu3 %v137_v39  ;;  %323 = vmatpush.msrb.mxu0 %v189_v40  ;;  %2117 = sst [smem:[#allocation38_spill]] %s1782_s18  ;;  %s597_s3 = sshll.u32 %s2070_s19, 4  ;;  %v73_v18 = vld [vmem:[%s2111_s8 + $0x20] sm:$0x3]  ;;  %v238_v36 = vld [vmem:[%s2121_s5 + $0x8] sm:$0xff]  ;;  %s1815_s3 = int_to_ptr.hbm [resolvable:$true] %s597_s3 }
  0x58   :  { %343 = vmatpush.msrb.mxu1 %v208_v41  ;;  %774 = vmatpush.msrb.mxu3 %v208_v41  ;;  %s673_s2 = sshll.u32 %s1211_s13, 4  ;;  %s1213_s18 = smov [#allocation19]   ;;  %v237_v23 = vld [vmem:[%s2121_s5] sm:$0xff]  ;;  %v386_v38 = vld [vmem:[%s2114_s28 + $0x8] sm:$0xff]  ;;  %s674_s2 = int_to_ptr.vmem [resolvable:$true] %s673_s2 }
  0x59   :  { %366 = vmatpush.msrb.mxu2 %v224_v42  ;;  %324 = vmatmul.f32.vlgmr.msrb.gmra.mxu0 %v132_v43  ;;  %s1822_s22 = sshll.u32 %s1213_s18, 4  ;;  %s1216_s19 = smov [#allocation22]   ;;  %v424_v26 = vld [vmem:[%s2115_s9] sm:$0xff]  ;;  %v425_v40 = vld [vmem:[%s2115_s9 + $0x8] sm:$0xff]  ;;  %s622_s22 = int_to_ptr.vmem [resolvable:$true] %s1822_s22 }
  0x5a   :  { %344 = vmatpush.msrb.mxu1 %v207_v44  ;;  %775 = vmatpush.msrb.mxu3 %v207_v44  ;;  %s1835_s29 = sshll.u32 %s1216_s19, 4  ;;  %s1862_s19 = sshll.u32 %s1218_s10, 4  ;;  %s648_s29 = int_to_ptr.vmem [resolvable:$true] %s1835_s29  ;;  %s505_s19 = int_to_ptr.vmem [resolvable:$true] %s1862_s19 }
  0x5b   :  { %367 = vmatpush.msrb.mxu2 %v223_v45  ;;  %802 = vset.pattern.permute.xlu1 %v1206_v49  ;;  %s506_s8 = sshll.u32 %s2063_s12, 4  ;;  %s1869_s27 = sshll.u32 %s1219_s23, 4  ;;  %s1877_s8 = int_to_ptr.hbm [resolvable:$true] %s506_s8  ;;  %s531_s27 = int_to_ptr.vmem [resolvable:$true] %s1869_s27 }
  0x5c   :  { %345 = vmatpush.msrb.mxu1 %v206_v46  ;;  %776 = vmatpush.msrb.mxu3 %v206_v46  ;;  %s2122_s0 = sld [smem:[#allocation36_spill]]  ;;  %s1220_s12 = smov [#allocation12]  }
  0x5d   :  { %368 = vmatpush.msrb.mxu2 %v222_v47  ;;  %801 = vset.pattern.permute.xlu0 %v1206_v49  ;;  %s1881_s10 = sshll.u32 %s1220_s12, 4  ;;  %s558_s23 = sshll.u32 %s2067_s16, 4  ;;  %s557_s10 = int_to_ptr.vmem [resolvable:$true] %s1881_s10  ;;  %s1908_s23 = int_to_ptr.hbm [resolvable:$true] %s558_s23 }
  0x5e   :  { %346 = vmatpush.msrb.mxu1 %v205_v48  ;;  %777 = vmatpush.msrb.mxu3 %v205_v48  ;;  %s2123_s12 = sld [smem:[#allocation37_spill]]  ;;  %s1221_s16 = smov 64  }
  0x5f   :  { %369 = vmatpush.msrb.mxu2 %v221_v50  ;;  %347 = vmatmul.f32.vlgmr.msrb.gmra.mxu1 %v133_v51  ;;  %s1222_s18 = smov 4   ;;  %s2125_s28 = sld [smem:[#allocation38_spill]] }
  0x60   :  { %350 = vmatmul.f32.vlgmr.msrb.gmra.mxu3 %v139_v52  ;;  %370 = vmatmul.f32.vlgmr.msrb.gmra.mxu2 %v134_v53  ;;  %s1224_s13 = smov [#allocation24]  }
  0x61   :  { %327 = vmatmul.f32.gmra.mxu0 %v138_v54  ;;  %405 = vperm.xlu1 %802, %v382_v55  }
  0x62   :  { %390 = vperm.xlu0 %801, %v379_v56   ;;  %803 = vset.pattern.permute.xlu2 %v1206_v49 }
  0x63   :  { %400 = vperm.xlu2 %803, %v381_v57  }
  0x65   :  { %s2127_s17 = int_to_ptr.vmem [resolvable:$true] %s2125_s28  ;;  %s2132_s28 = sld [smem:[#allocation53_spill]] }
  0x68   :  { %373 = vmatmul.f32.gmra.mxu2 %v140_v58 }
  0x69   :  { %410 = vperm.xlu1 %802, %v383_v59  }
  0x6a   :  { %395 = vperm.xlu0 %801, %v380_v60  }
  0x6b   :  { %415 = vperm.xlu2 %803, %v384_v61  }
  0xa8   :  { %v107_v63 = vpop.f32.mrf.mxu0 }
  0xa9   :  { %v108_v0 = vadd.f32 %v107_v63, %v69_v62 }
  0xab   :  { %123 = vst.msk [vmem:[%s2112_s4] sm:$0xff] %vm122_vm1, %v108_v0 }
  0xb0   :  { %v110_v2 = vpop.f32.mrf.mxu0 }
  0xb1   :  { %v111_v3 = vadd.f32 %v110_v2, %v70_v1 }
  0xb3   :  { %124 = vst.msk [vmem:[%s2112_s4 + $0x8] sm:$0xff] %vm122_vm1, %v111_v3 }
  0xb8   :  { %v113_v5 = vpop.f32.mrf.mxu0 }
  0xb9   :  { %v114_v7 = vadd.f32 %v113_v5, %v71_v4 }
  0xbb   :  { %125 = vst.msk [vmem:[%s2112_s4 + $0x10] sm:$0xff] %vm122_vm1, %v114_v7 }
  0xbd   :  { %v401_v9 = vpop.permute.xlu2 %400 }
  0xbe   :  { %v420_v10 = vmul.f32 %v401_v9, %v387_v6 }
  0xc0   :  { %v429_v11 = vadd.f32 %v426_v8, %v420_v10 }
  0xc2   :  { %468 = vst.msk [vmem:[#allocation24] sm:$0x1] %vm448_vm2, %v429_v11  ;;  %v116_v13 = vpop.f32.mrf.mxu0 }
  0xc3   :  { %470 = vst.msk [vmem:[#allocation25 - $0x1] sm:$0x2] %vm451_vm3, %v429_v11  ;;  %v117_v14 = vadd.f32 %v116_v13, %v72_v12 }
  0xc5   :  { %v416_v15 = vpop.permute.xlu2 %415  ;;  %126 = vst.msk [vmem:[%s2112_s4 + $0x18] sm:$0xff] %vm122_vm1, %v117_v14 }
  0xc6   :  { %v423_v16 = vmul.f32 %v416_v15, %v387_v6 }
  0xc8   :  { %v432_v17 = vadd.f32 %v426_v8, %v423_v16 }
  0xc9   :  { %v256_v19 = vpop.f32.mrf.mxu1 }
  0xca   :  { %469 = vst.msk [vmem:[#allocation24 + $0x1] sm:$0x1] %vm448_vm2, %v432_v17  ;;  %v257_v28 = vadd.f32 %v256_v19, %v237_v23 }
  0xcb   :  { %471 = vst.msk [vmem:[#allocation25] sm:$0x2] %vm451_vm3, %v432_v17 }
  0xcc   :  { %v119_v20 = vpop.f32.mrf.mxu0  ;;  %681 = dma.vmem_to_hbm [thread:$0]  %s674_s2, 32, %s676_s24, [#allocation26], %s1214_s25, %s1214_s25, %s1215_s26  }
  0xcd   :  { %v120_v21 = vadd.f32 %v119_v20, %v73_v18  ;;  %s1217_s24 = smov [#allocation2]  }
  0xce   :  { %s1840_s2 = sshll.u32 %s1217_s24, 4  ;;  %s2124_s24 = int_to_ptr.vmem [resolvable:$true] %s2122_s0 }
  0xcf   :  { %128 = vst.msk [vmem:[%s2112_s4 + $0x20] sm:$0x3] %vm127_vm4, %v120_v21  ;;  %2120 = sst [smem:[#allocation41_spill]] %s1840_s2  ;;  %s532_s4 = sshll.u32 %s2065_s14, 4  ;;  %s1895_s4 = int_to_ptr.hbm [resolvable:$true] %s532_s4 }
  0xd0   :  { %v279_v22 = vpop.f32.mrf.mxu2  ;;  %v302_v25 = vpop.f32.mrf.mxu3  ;;  %s610_s14 = sshll.u32 %s2071_s20, 4  ;;  %s2128_s20 = sld [smem:[#allocation39_spill]]  ;;  %s1949_s14 = int_to_ptr.hbm [resolvable:$true] %s610_s14 }
  0xd1   :  { %v280_v35 = vadd.f32 %v279_v22, %v257_v28 }
  0xd3   :  { %v406_v27 = vpop.permute.xlu1 %405  ;;  %v259_v31 = vpop.f32.mrf.mxu1  ;;  %v303_v42 = vadd.f32 %v302_v25, %v280_v35 }
  0xd4   :  { %v421_v29 = vmul.f32 %v406_v27, %v385_v24  ;;  %v391_v30 = vpop.permute.xlu0 %390  ;;  %v260_v43 = vadd.f32 %v259_v31, %v238_v36 }
  0xd5   :  { %v418_v32 = vmul.f32 %v391_v30, %v385_v24 }
  0xd6   :  { %v1867_v33 = vadd.f32 %v424_v26, %v421_v29  ;;  %v325_v39 = vpop.f32.mrf.mxu0 }
  0xd7   :  { %v1874_v34 = vadd.f32 %v424_v26, %v418_v32  ;;  %v326_v51 = vadd.f32 %v325_v39, %v303_v42 }
  0xd8   :  { %435 = vst.msk [vmem:[#allocation4 + $0x4] sm:$0xf] %vm433_vm5, %v1867_v33 }
  0xd9   :  { %v282_v37 = vpop.f32.mrf.mxu2  ;;  %434 = vst.msk [vmem:[#allocation4] sm:$0xf] %vm433_vm5, %v1874_v34 }
  0xda   :  { %499 = dma.vmem_to_hbm [thread:$0]  %s2124_s24, 128, %s1765_s6, [#allocation5], %s1221_s16, %s1221_s16, %s1222_s18   ;;  %440 = vst.msk [vmem:[#allocation7 - $0x5] sm:$0x20] %vm439_vm6, %v1874_v34  ;;  %v305_v46 = vpop.f32.mrf.mxu3  ;;  %v283_v52 = vadd.f32 %v282_v37, %v260_v43 }
  0xdb   :  { %v411_v41 = vpop.permute.xlu1 %410  ;;  %441 = vst.msk [vmem:[#allocation7 - $0x4] sm:$0x20] %vm439_vm6, %v1867_v33  ;;  %s2126_s6 = int_to_ptr.vmem [resolvable:$true] %s2123_s12  ;;  %s1953_s12 = sshll.u32 %s1224_s13, 4  ;;  %s661_s12 = int_to_ptr.vmem [resolvable:$true] %s1953_s12 }
  0xdc   :  { %v422_v44 = vmul.f32 %v411_v41, %v386_v38  ;;  %v396_v45 = vpop.permute.xlu0 %395  ;;  %525 = dma.vmem_to_hbm [thread:$0]  %s2126_s6, 32, %s1788_s30, [#allocation8], %s1214_s25, %s1214_s25, %s1215_s26   ;;  %446 = vst.msk [vmem:[#allocation10 - $0x7] sm:$0x80] %vm445_vm7, %v1874_v34  ;;  %v348_v49 = vpop.f32.mrf.mxu1  ;;  %v306_v55 = vadd.f32 %v305_v46, %v283_v52 }
  0xdd   :  { %v419_v47 = vmul.f32 %v396_v45, %v386_v38  ;;  %447 = vst.msk [vmem:[#allocation10 - $0x6] sm:$0x80] %vm445_vm7, %v1867_v33  ;;  %s1223_s30 = smov [#allocation18]   ;;  %v349_v53 = vadd.f32 %v348_v49, %v326_v51  ;;  %s2129_s16 = sld [smem:[#allocation54_spill]] }
  0xde   :  { %v1923_v48 = vadd.f32 %v425_v40, %v422_v44  ;;  %551 = dma.vmem_to_hbm [thread:$0]  %s2127_s17, 32, %s1791_s1, [#allocation11], %s1214_s25, %s1214_s25, %s1215_s26   ;;  %437 = vst.msk [vmem:[#allocation6 - $0x4] sm:$0x10] %vm436_vm8, %v1874_v34  ;;  %v328_v57 = vpop.f32.mrf.mxu0 }
  0xdf   :  { %v1933_v50 = vadd.f32 %v425_v40, %v419_v47  ;;  %438 = vst.msk [vmem:[#allocation6 - $0x3] sm:$0x10] %vm436_vm8, %v1867_v33  ;;  %s1947_s1 = sshll.u32 %s1223_s30, 4  ;;  %s2130_s24 = int_to_ptr.vmem [resolvable:$true] %s2128_s20  ;;  %v329_v59 = vadd.f32 %v328_v57, %v306_v55  ;;  %s609_s1 = int_to_ptr.vmem [resolvable:$true] %s1947_s1 }
  0xe0   :  { %450 = vst.msk [vmem:[#allocation12 + $0x1] sm:$0x1] %vm448_vm2, %v1923_v48  ;;  %512 = dma.vmem_to_hbm [thread:$0]  %s505_s19, 32, %s1877_s8, [#allocation5], %s1214_s25, %s1214_s25, %s1215_s26  }
  0xe1   :  { %453 = vst.msk [vmem:[#allocation13] sm:$0x2] %vm451_vm3, %v1923_v48  ;;  %s636_s6 = sshll.u32 %s2132_s28, 4  ;;  %s2135_s17 = sld [smem:[#allocation52_spill]]  ;;  %s637_s6 = int_to_ptr.hbm [resolvable:$true] %s636_s6 }
  0xe2   :  { %449 = vst.msk [vmem:[#allocation12] sm:$0x1] %vm448_vm2, %v1933_v50  ;;  %s1228_s30 = smov 8  }
  0xe3   :  { %s662_s18 = sshll.u32 %s2129_s16, 4  ;;  %452 = vst.msk [vmem:[#allocation13 - $0x1] sm:$0x2] %vm451_vm3, %v1933_v50  ;;  %v371_v54 = vpop.f32.mrf.mxu2  ;;  %v351_v58 = vpop.f32.mrf.mxu3  ;;  %s663_s18 = int_to_ptr.hbm [resolvable:$true] %s662_s18 }
  0xe4   :  { %564 = dma.vmem_to_hbm [thread:$0]  %s557_s10, 32, %s1908_s23, [#allocation11], %s1214_s25, %s1214_s25, %s1215_s26   ;;  %v372_v56 = vadd.f32 %v371_v54, %v349_v53  ;;  %462 = vst.msk [vmem:[#allocation19 - $0x5] sm:$0x20] %vm439_vm6, %v1933_v50  ;;  %v352_v60 = vadd.f32 %v351_v58, %v329_v59 }
  0xe5   :  { %577 = dma.vmem_to_hbm [thread:$0]  %s2130_s24, 32, %s1813_s7, [#allocation14], %s1214_s25, %s1214_s25, %s1215_s26   ;;  %463 = vst.msk [vmem:[#allocation19 - $0x4] sm:$0x20] %vm439_vm6, %v1923_v48 }
  0xe6   :  { %377 = vst.msk [vmem:[#allocation2] sm:$0xff] %vm122_vm1, %v372_v56  ;;  %629 = dma.vmem_to_hbm [thread:$0]  %s622_s22, 32, %s1845_s11, [#allocation20], %s1214_s25, %s1214_s25, %s1215_s26  }
  0xe7   :  { %s2131_s7 = sld [smem:[#allocation40_spill]]  ;;  %466 = vst.msk [vmem:[#allocation22 - $0x7] sm:$0x80] %vm445_vm7, %v1933_v50  ;;  %s1225_s10 = smov [#allocation21]  }
  0xe8   :  { %467 = vst.msk [vmem:[#allocation22 - $0x6] sm:$0x80] %vm445_vm7, %v1923_v48  ;;  %s1989_s23 = sshll.u32 %s1225_s10, 4  ;;  %s2133_s22 = sld [smem:[#allocation41_spill]]  ;;  %s635_s23 = int_to_ptr.vmem [resolvable:$true] %s1989_s23 }
  0xe9   :  { %458 = vst.msk [vmem:[#allocation16 - $0x3] sm:$0x8] %vm457_vm9, %v1933_v50  ;;  %655 = dma.vmem_to_hbm [thread:$0]  %s648_s29, 32, %s1847_s15, [#allocation23], %s1214_s25, %s1214_s25, %s1215_s26  }
  0xea   :  { %459 = vst.msk [vmem:[#allocation16 - $0x2] sm:$0x8] %vm457_vm9, %v1923_v48  ;;  %668 = dma.vmem_to_hbm [thread:$0]  %s661_s12, 32, %s663_s18, [#allocation23], %s1214_s25, %s1214_s25, %s1215_s26  }
  0xeb   :  { %v374_v61 = vpop.f32.mrf.mxu2  ;;  %460 = vst.msk [vmem:[#allocation18 - $0x4] sm:$0x10] %vm436_vm8, %v1933_v50  ;;  %s1226_s15 = smov [#allocation15]   ;;  %s584_s20 = sshll.u32 %s2135_s17, 4  ;;  %s585_s20 = int_to_ptr.hbm [resolvable:$true] %s584_s20 }
  0xec   :  { %v375_v62 = vadd.f32 %v374_v61, %v352_v60  ;;  %461 = vst.msk [vmem:[#allocation18 - $0x3] sm:$0x10] %vm436_vm8, %v1923_v48  ;;  %s582_s29 = sshll.u32 %s1226_s15, 4  ;;  %s583_s29 = int_to_ptr.vmem [resolvable:$true] %s582_s29 }
  0xed   :  { %s2134_s11 = int_to_ptr.vmem [resolvable:$true] %s2131_s7  ;;  %443 = vst.msk [vmem:[#allocation9 - $0x6] sm:$0x40] %vm442_vm10, %v1874_v34 }
  0xee   :  { %603 = dma.vmem_to_hbm [thread:$0]  %s2134_s11, 32, %s1815_s3, [#allocation17], %s1214_s25, %s1214_s25, %s1215_s26   ;;  %378 = vst.msk [vmem:[#allocation2 + $0x8] sm:$0xff] %vm122_vm1, %v375_v62 }
  0xef   :  { %616 = dma.vmem_to_hbm [thread:$0]  %s609_s1, 32, %s1949_s14, [#allocation17], %s1214_s25, %s1214_s25, %s1215_s26   ;;  %444 = vst.msk [vmem:[#allocation9 - $0x5] sm:$0x40] %vm442_vm10, %v1867_v33 }
  0xf0   :  { %s1227_s3 = smov 128   ;;  %s2136_s13 = int_to_ptr.vmem [resolvable:$true] %s2133_s22  ;;  %464 = vst.msk [vmem:[#allocation21 - $0x6] sm:$0x40] %vm442_vm10, %v1933_v50 }
  0xf1   :  { %486 = dma.vmem_to_hbm [thread:$0]  %s2136_s13, 256, %s1857_s21, [#allocation3], %s1227_s3, %s1227_s3, %s1228_s30   ;;  %465 = vst.msk [vmem:[#allocation21 - $0x5] sm:$0x40] %vm442_vm10, %v1923_v48 }
  0xf2   :  { %538 = dma.vmem_to_hbm [thread:$0]  %s531_s27, 32, %s1895_s4, [#allocation8], %s1214_s25, %s1214_s25, %s1215_s26   ;;  %455 = vst.msk [vmem:[#allocation15 - $0x2] sm:$0x4] %vm454_vm11, %v1933_v50 }
  0xf3   :  { %642 = dma.vmem_to_hbm [thread:$0]  %s635_s23, 32, %s637_s6, [#allocation20], %s1214_s25, %s1214_s25, %s1215_s26   ;;  %456 = vst.msk [vmem:[#allocation15 - $0x1] sm:$0x4] %vm454_vm11, %v1923_v48 }
  0xf4   :  { %590 = dma.vmem_to_hbm [thread:$0]  %s583_s29, 32, %s585_s20, [#allocation14], %s1214_s25, %s1214_s25, %s1215_s26  }
  0xf5   :  { %1188 = dma.done.wait [#allocation3], 256  }
  0xf6   :  { %1189 = vsyncadd [#allocation3], 4294967040 }
  0xf7   :  { %1190 = dma.done.wait [#allocation5], 160  }
  0xf8   :  { %1191 = vsyncadd [#allocation5], 4294967136 }
  0xf9   :  { %1192 = dma.done.wait [#allocation8], 64  }
  0xfa   :  { %1193 = vsyncadd [#allocation8], 4294967232 }
  0xfb   :  { %1194 = dma.done.wait [#allocation11], 64  }
  0xfc   :  { %1195 = vsyncadd [#allocation11], 4294967232 }
  0xfd   :  { %1196 = dma.done.wait [#allocation14], 64  }
  0xfe   :  { %1197 = vsyncadd [#allocation14], 4294967232 }
  0xff   :  { %1198 = dma.done.wait [#allocation17], 64  }
 0x100   :  { %1199 = vsyncadd [#allocation17], 4294967232 }
 0x101   :  { %1200 = dma.done.wait [#allocation20], 64  }
 0x102   :  { %1201 = vsyncadd [#allocation20], 4294967232 }
 0x103   :  { %1202 = dma.done.wait [#allocation23], 64  }
 0x104   :  { %1203 = vsyncadd [#allocation23], 4294967232 }
 0x105   :  { %1204 = dma.done.wait [#allocation26], 32  }
 0x106   :  { %1205 = vsyncadd [#allocation26], 4294967264 }
 0x107   :  { %748 = vsyncpa [#allocation3], 1 }
 0x108   :  { %749 = vsyncpa [#allocation5], 1 }
 0x109   :  { %750 = vsyncpa [#allocation8], 1 }
 0x10a   :  { %751 = vsyncpa [#allocation11], 1 }
 0x10b   :  { %752 = vsyncpa [#allocation14], 1 }
 0x10c   :  { %753 = vsyncpa [#allocation17], 1 }
 0x10d   :  { %754 = vsyncpa [#allocation20], 1 }
 0x10e   :  { %755 = vsyncpa [#allocation23], 1 }
 0x10f   :  { %756 = vsyncpa [#allocation26], 1 }

</bundles_post_ra>
